<compile_context>
chip_gen: v7x
topology: tpu7x:2x2x1
jax: 0.10.0
libtpu: 0.0.40
codegen_flags: <defaults>
</compile_context>

<pallas_src>
import functools

import jax
import jax.numpy as jnp
from jax.experimental import pallas as pl
from jax.experimental.pallas import tpu as pltpu


def _round_up(n, m):
    return ((n + m - 1) // m) * m


def linear_kernel(x_ref, w_ref, b_ref, o_ref):
    # x_ref: (TM, IN)   w_ref: (OUT_P, IN)   b_ref: (1, OUT_P)   o_ref: (TM, OUT_P)
    # Contract dim 1 of x with dim 1 of w (PyTorch weight layout) -> no vxpose,
    # single vmatmul push with f32 accumulation.
    acc = jax.lax.dot_general(
        x_ref[...],
        w_ref[...],
        dimension_numbers=(((1,), (1,)), ((), ())),
        preferred_element_type=jnp.float32,
    )
    o_ref[...] = (acc + b_ref[...]).astype(o_ref.dtype)


@functools.partial(jax.jit, static_argnames=("tm",))
def linear_pallas(x, weight, bias, *, tm=1024):
    """y = x @ weight.T + bias   (exact nn.Linear semantics)."""
    B, in_f = x.shape
    out_f, in_f2 = weight.shape
    assert in_f == in_f2

    # --- lane-dense padding of the output/feature dim (10 -> 128) ----------
    OUT_P = 128
    w_pad = jnp.zeros((OUT_P, in_f), weight.dtype).at[:out_f, :].set(weight)
    b_pad = jnp.zeros((1, OUT_P), bias.dtype).at[0, :out_f].set(bias)

    # --- batch tiling -------------------------------------------------------
    # TM=1024 f32 rows double-buffered (~6.4 MB) fits even the v5e 16 MiB
    # scoped-VMEM default; pad B up so the grid divides evenly.
    tm_eff = min(tm, _round_up(B, 8))
    B_pad = _round_up(B, tm_eff)
    if B_pad != B:
        x = jnp.pad(x, ((0, B_pad - B), (0, 0)))

    grid = (B_pad // tm_eff,)

    cost = pl.CostEstimate(
        flops=2 * B_pad * in_f * OUT_P,
        transcendentals=0,
        bytes_accessed=(B_pad * in_f + OUT_P * in_f + B_pad * OUT_P) * 4,
    )

    y_pad = pl.pallas_call(
        linear_kernel,
        out_shape=jax.ShapeDtypeStruct((B_pad, OUT_P), x.dtype),
        grid_spec=pltpu.PrefetchScalarGridSpec(
            num_scalar_prefetch=0,
            grid=grid,
            in_specs=[
                pl.BlockSpec((tm_eff, in_f), lambda i: (i, 0)),   # x tiles stream
                pl.BlockSpec((OUT_P, in_f), lambda i: (0, 0)),    # weight resident
                pl.BlockSpec((1, OUT_P), lambda i: (0, 0)),       # bias resident
            ],
            out_specs=pl.BlockSpec((tm_eff, OUT_P), lambda i: (i, 0)),
        ),
        compiler_params=pltpu.CompilerParams(
            dimension_semantics=("parallel",),
        ),
        cost_estimate=cost,
    )(x, w_pad, b_pad)

    # Strip batch padding and the lane padding of the output features.
    return y_pad[:B, :out_f]


if __name__ == "__main__":
    key = jax.random.PRNGKey(0)
    k_x, k_w, k_b = jax.random.split(key, 3)

    B, IN_F, OUT_F = 8, 784, 10

    # Deterministic parameter init (PyTorch nn.Linear default: U(-1/sqrt(in), 1/sqrt(in)))
    bound = 1.0 / jnp.sqrt(jnp.float32(IN_F))
    weight = jax.random.uniform(k_w, (OUT_F, IN_F), jnp.float32, -bound, bound)
    bias = jax.random.uniform(k_b, (OUT_F,), jnp.float32, -bound, bound)

    x = jax.random.normal(k_x, (B, IN_F), jnp.float32)

    y = linear_pallas(x, weight, bias)
    jax.block_until_ready(y)

    # Cross-check against plain JAX reference.
    y_ref = x @ weight.T + bias
    assert y.shape == (B, OUT_F)
    assert jnp.allclose(y, y_ref, atol=1e-4, rtol=1e-4)

    print("KERNEL_OK")
</pallas_src>

<mosaic_0001>
module attributes {stable_mosaic.version = 11 : i64} {
  func.func @linear_kernel(%arg0: i32, %arg1: memref<8x784xf32, #tpu.memory_space<vmem>>, %arg2: memref<128x784xf32, #tpu.memory_space<vmem>>, %arg3: memref<1x128xf32, #tpu.memory_space<vmem>>, %arg4: memref<8x128xf32, #tpu.memory_space<vmem>>) attributes {dimension_semantics = [#tpu.dimension_semantics<parallel>], iteration_bounds = array<i64: 1>, scalar_prefetch = 0 : i64, scratch_operands = 0 : i64, tpu.core_type = #tpu.core_type<tc>, window_params = [{transform_indices = @transform_0, window_bounds = array<i64: 8, 784>}, {pipeline_mode = #tpu.pipeline_mode<synchronous>, transform_indices = @transform_1, window_bounds = array<i64: 128, 784>}, {pipeline_mode = #tpu.pipeline_mode<synchronous>, transform_indices = @transform_2, window_bounds = array<i64: 1, 128>}, {transform_indices = @transform_3, window_bounds = array<i64: 8, 128>}]} {
    %c0 = arith.constant 0 : index
    %c0_0 = arith.constant 0 : index
    %0 = vector.load %arg1[%c0, %c0_0] : memref<8x784xf32, #tpu.memory_space<vmem>>, vector<8x784xf32>
    %c0_1 = arith.constant 0 : index
    %c0_2 = arith.constant 0 : index
    %1 = vector.load %arg2[%c0_1, %c0_2] : memref<128x784xf32, #tpu.memory_space<vmem>>, vector<128x784xf32>
    %cst = arith.constant dense<0.000000e+00> : vector<8x128xf32>
    %2 = tpu.matmul %0, %1, %cst {dimension_numbers = #tpu.dot_dimension_numbers<[1], [1], [0], [0], [0, 0, 1, 0], [], []>} : vector<8x784xf32>, vector<128x784xf32>, vector<8x128xf32> -> vector<8x128xf32>
    %c0_3 = arith.constant 0 : index
    %c0_4 = arith.constant 0 : index
    %3 = vector.load %arg3[%c0_3, %c0_4] : memref<1x128xf32, #tpu.memory_space<vmem>>, vector<1x128xf32>
    %4 = vector.broadcast %3 : vector<1x128xf32> to vector<8x128xf32>
    %5 = arith.addf %2, %4 : vector<8x128xf32>
    %c0_5 = arith.constant 0 : index
    %c0_6 = arith.constant 0 : index
    %6 = vector.load %arg4[%c0_5, %c0_6] : memref<8x128xf32, #tpu.memory_space<vmem>>, vector<8x128xf32>
    tpu.vector_store %arg4[%c0_5, %c0_6], %5 {strides = array<i32>} : memref<8x128xf32, #tpu.memory_space<vmem>>, vector<8x128xf32>,
    return
  }
  func.func @transform_0(%arg0: i32) -> (i32, i32) {
    %c0_i32 = arith.constant 0 : i32
    %c0_i32_0 = arith.constant 0 : i32
    return %arg0, %c0_i32 : i32, i32
  }
  func.func @transform_1(%arg0: i32) -> (i32, i32) {
    %c0_i32 = arith.constant 0 : i32
    %c0_i32_0 = arith.constant 0 : i32
    %c0_i32_1 = arith.constant 0 : i32
    return %c0_i32, %c0_i32_0 : i32, i32
  }
  func.func @transform_2(%arg0: i32) -> (i32, i32) {
    %c0_i32 = arith.constant 0 : i32
    %c0_i32_0 = arith.constant 0 : i32
    %c0_i32_1 = arith.constant 0 : i32
    return %c0_i32, %c0_i32_0 : i32, i32
  }
  func.func @transform_3(%arg0: i32) -> (i32, i32) {
    %c0_i32 = arith.constant 0 : i32
    %c0_i32_0 = arith.constant 0 : i32
    return %arg0, %c0_i32 : i32, i32
  }
}

</mosaic_0001>

<bundles_post_ra>
// kernel: linear_pallas.1
= control target key start
LH: loop header
LB: loop body
LE: loop exit
PB: predicated region body
PF: predicated region fallthrough
CT: control target
= control target key end

     0   :  { %s1147_s0 = inlined_call_operand.vmem [shape: f32[8,784], index: 0, kind: input, shape index: {}]   ;;  %s1148_s1 = inlined_call_operand.vmem [shape: f32[128,784], index: 1, kind: input, shape index: {}]   ;;  %s1149_s2 = inlined_call_operand.vmem [shape: f32[1,128], index: 2, kind: input, shape index: {}]   ;;  %s1150_s3 = inlined_call_operand.hbm [shape: f32[8,128], index: 3, kind: output, shape index: {}]  }
   0x1   :  { %v23_v0 = vld [vmem:[%s1148_s1 + $0x8] sm:$0xff]  ;;  %v30_v1 = vld [vmem:[%s1148_s1 + $0x40] sm:$0xff]  ;;  %v29_v6 = vld [vmem:[%s1148_s1 + $0x38] sm:$0xff] }
   0x2   :  { %v27_v2 = vld [vmem:[%s1148_s1 + $0x28] sm:$0xff]  ;;  %v558_v3 = vpack.c.bf16 %v30_v1, %v23_v0  ;;  %v34_v4 = vld [vmem:[%s1148_s1 + $0x60] sm:$0xff]  ;;  %v33_v10 = vld [vmem:[%s1148_s1 + $0x58] sm:$0xff] }
   0x3   :  { %v22_v5 = vld [vmem:[%s1148_s1] sm:$0xff]  ;;  %v622_v7 = vpack.c.bf16 %v34_v4, %v27_v2  ;;  %v37_v11 = vld [vmem:[%s1148_s1 + $0x78] sm:$0xff]  ;;  %v44_v13 = vld [vmem:[%s1148_s1 + $0xb0] sm:$0xff] }
   0x4   :  { %v560_v8 = vpack.c.bf16 %v29_v6, %v22_v5  ;;  %v26_v9 = vld [vmem:[%s1148_s1 + $0x20] sm:$0xff]  ;;  %559 = vmatprep.subr.bf16.mxu1 %v558_v3  ;;  %v41_v14 = vld [vmem:[%s1148_s1 + $0x98] sm:$0xff]  ;;  %v48_v15 = vld [vmem:[%s1148_s1 + $0xd0] sm:$0xff]  ;;  %v562_v16 = vpack.c.bf16 %v44_v13, %v37_v11 }
   0x5   :  { %v624_v12 = vpack.c.bf16 %v33_v10, %v26_v9  ;;  %623 = vmatprep.subr.bf16.mxu0 %v622_v7  ;;  %v626_v17 = vpack.c.bf16 %v48_v15, %v41_v14  ;;  %v36_v18 = vld [vmem:[%s1148_s1 + $0x70] sm:$0xff]  ;;  %v43_v19 = vld [vmem:[%s1148_s1 + $0xa8] sm:$0xff]  ;;  %v58_v23 = vld [vmem:[%s1148_s1 + $0x120] sm:$0xff] }
   0x6   :  { %561 = vmatpush1.bf16.xpose.msra.mxu1 %v560_v8  ;;  %v40_v20 = vld [vmem:[%s1148_s1 + $0x90] sm:$0xff]  ;;  %v47_v21 = vld [vmem:[%s1148_s1 + $0xc8] sm:$0xff]  ;;  %v62_v25 = vld [vmem:[%s1148_s1 + $0x140] sm:$0xff]  ;;  %v564_v26 = vpack.c.bf16 %v43_v19, %v36_v18 }
   0x7   :  { %625 = vmatpush1.bf16.xpose.msra.mxu0 %v624_v12  ;;  %563 = vmatprep.subr.bf16.mxu1 %v562_v16  ;;  %v51_v22 = vld [vmem:[%s1148_s1 + $0xe8] sm:$0xff]  ;;  %v628_v27 = vpack.c.bf16 %v47_v21, %v40_v20  ;;  %v50_v30 = vld [vmem:[%s1148_s1 + $0xe0] sm:$0xff]  ;;  %v57_v31 = vld [vmem:[%s1148_s1 + $0x118] sm:$0xff] }
   0x8   :  { %627 = vmatprep.subr.bf16.mxu0 %v626_v17  ;;  %v55_v24 = vld [vmem:[%s1148_s1 + $0x108] sm:$0xff]  ;;  %v566_v28 = vpack.c.bf16 %v58_v23, %v51_v22  ;;  %v54_v32 = vld [vmem:[%s1148_s1 + $0x100] sm:$0xff]  ;;  %v61_v33 = vld [vmem:[%s1148_s1 + $0x138] sm:$0xff]  ;;  %v568_v38 = vpack.c.bf16 %v57_v31, %v50_v30 }
   0x9   :  { %v630_v29 = vpack.c.bf16 %v62_v25, %v55_v24  ;;  %v65_v34 = vld [vmem:[%s1148_s1 + $0x158] sm:$0xff]  ;;  %v72_v35 = vld [vmem:[%s1148_s1 + $0x190] sm:$0xff]  ;;  %v632_v39 = vpack.c.bf16 %v61_v33, %v54_v32  ;;  %v71_v43 = vld [vmem:[%s1148_s1 + $0x188] sm:$0xff] }
   0xa   :  { %v69_v36 = vld [vmem:[%s1148_s1 + $0x178] sm:$0xff]  ;;  %v76_v37 = vld [vmem:[%s1148_s1 + $0x1b0] sm:$0xff]  ;;  %v570_v40 = vpack.c.bf16 %v72_v35, %v65_v34  ;;  %v75_v45 = vld [vmem:[%s1148_s1 + $0x1a8] sm:$0xff] }
   0xb   :  { %v634_v41 = vpack.c.bf16 %v76_v37, %v69_v36  ;;  %v64_v42 = vld [vmem:[%s1148_s1 + $0x150] sm:$0xff]  ;;  %v16_v46 = vld [vmem:[%s1147_s0 + $0x8] sm:$0xff]  ;;  %v86_v48 = vld [vmem:[%s1148_s1 + $0x200] sm:$0xff] }
   0xc   :  { %v68_v44 = vld [vmem:[%s1148_s1 + $0x170] sm:$0xff]  ;;  %v79_v47 = vld [vmem:[%s1148_s1 + $0x1c8] sm:$0xff]  ;;  %257 = vmatprep.mubr.f32.mxu1 %v16_v46  ;;  %v90_v51 = vld [vmem:[%s1148_s1 + $0x220] sm:$0xff]  ;;  %v572_v52 = vpack.c.bf16 %v71_v43, %v64_v42 }
   0xd   :  { %v20_v49 = vld [vmem:[%s1147_s0 + $0x28] sm:$0xff]  ;;  %v636_v53 = vpack.c.bf16 %v75_v45, %v68_v44  ;;  %v574_v54 = vpack.c.bf16 %v86_v48, %v79_v47  ;;  %v78_v56 = vld [vmem:[%s1148_s1 + $0x1c0] sm:$0xff]  ;;  %v85_v57 = vld [vmem:[%s1148_s1 + $0x1f8] sm:$0xff] }
   0xe   :  { %565 = vmatpush1.bf16.xpose.msra.mxu1 %v564_v26  ;;  %v83_v50 = vld [vmem:[%s1148_s1 + $0x1e8] sm:$0xff]  ;;  %397 = vmatprep.mubr.f32.mxu0 %v20_v49  ;;  %v82_v58 = vld [vmem:[%s1148_s1 + $0x1e0] sm:$0xff]  ;;  %v89_v59 = vld [vmem:[%s1148_s1 + $0x218] sm:$0xff]  ;;  %v576_v0 = vpack.c.bf16 %v85_v57, %v78_v56 }
   0xf   :  { %629 = vmatpush1.bf16.xpose.msra.mxu0 %v628_v27  ;;  %567 = vmatprep.subr.bf16.mxu1 %v566_v28  ;;  %v638_v55 = vpack.c.bf16 %v90_v51, %v83_v50  ;;  %v93_v60 = vld [vmem:[%s1148_s1 + $0x238] sm:$0xff]  ;;  %v100_v61 = vld [vmem:[%s1148_s1 + $0x270] sm:$0xff]  ;;  %v640_v1 = vpack.c.bf16 %v89_v59, %v82_v58  ;;  %v99_v5 = vld [vmem:[%s1148_s1 + $0x268] sm:$0xff] }
  0x10   :  { %631 = vmatprep.subr.bf16.mxu0 %v630_v29  ;;  %v97_v62 = vld [vmem:[%s1148_s1 + $0x258] sm:$0xff]  ;;  %v104_v63 = vld [vmem:[%s1148_s1 + $0x290] sm:$0xff]  ;;  %v578_v2 = vpack.c.bf16 %v100_v61, %v93_v60  ;;  %v103_v7 = vld [vmem:[%s1148_s1 + $0x288] sm:$0xff] }
  0x11   :  { %v642_v3 = vpack.c.bf16 %v104_v63, %v97_v62  ;;  %v92_v4 = vld [vmem:[%s1148_s1 + $0x230] sm:$0xff]  ;;  %v107_v8 = vld [vmem:[%s1148_s1 + $0x2a8] sm:$0xff]  ;;  %v114_v9 = vld [vmem:[%s1148_s1 + $0x2e0] sm:$0xff] }
  0x12   :  { %v96_v6 = vld [vmem:[%s1148_s1 + $0x250] sm:$0xff]  ;;  %v111_v10 = vld [vmem:[%s1148_s1 + $0x2c8] sm:$0xff]  ;;  %v118_v11 = vld [vmem:[%s1148_s1 + $0x300] sm:$0xff]  ;;  %v580_v12 = vpack.c.bf16 %v99_v5, %v92_v4 }
  0x16   :  { %569 = vmatpush1.bf16.xpose.msra.mxu1 %v568_v38 }
  0x17   :  { %633 = vmatpush1.bf16.xpose.msra.mxu0 %v632_v39  ;;  %571 = vmatprep.subr.bf16.mxu1 %v570_v40 }
  0x18   :  { %635 = vmatprep.subr.bf16.mxu0 %v634_v41 }
  0x1e   :  { %573 = vmatpush1.bf16.xpose.msra.mxu1 %v572_v52 }
  0x1f   :  { %637 = vmatpush1.bf16.xpose.msra.mxu0 %v636_v53  ;;  %575 = vmatprep.subr.bf16.mxu1 %v574_v54 }
  0x20   :  { %639 = vmatprep.subr.bf16.mxu0 %v638_v55 }
  0x26   :  { %577 = vmatpush1.bf16.xpose.msra.mxu1 %v576_v0 }
  0x27   :  { %641 = vmatpush1.bf16.xpose.msra.mxu0 %v640_v1  ;;  %579 = vmatprep.subr.bf16.mxu1 %v578_v2 }
  0x28   :  { %643 = vmatprep.subr.bf16.mxu0 %v642_v3 }
  0x29   :  { %8 = vsyncpa [#allocation3], 0  ;;  %v644_v13 = vpack.c.bf16 %v103_v7, %v96_v6  ;;  %v582_v14 = vpack.c.bf16 %v114_v9, %v107_v8  ;;  %v646_v15 = vpack.c.bf16 %v118_v11, %v111_v10  ;;  %v106_v16 = vld [vmem:[%s1148_s1 + $0x2a0] sm:$0xff]  ;;  %v113_v17 = vld [vmem:[%s1148_s1 + $0x2d8] sm:$0xff]  ;;  %v720_v40 = vmov 0.0|0.0  }
  0x2a   :  { %v110_v18 = vld [vmem:[%s1148_s1 + $0x2c0] sm:$0xff]  ;;  %v117_v19 = vld [vmem:[%s1148_s1 + $0x2f8] sm:$0xff]  ;;  %v128_v21 = vld [vmem:[%s1148_s1 + $0x350] sm:$0xff]  ;;  %v584_v24 = vpack.c.bf16 %v113_v17, %v106_v16  ;;  %vm141_vm0 = vcmask 130048   ;;  %vm721_vm2 = vmmov 0   ;;  %v722_v57 = vmov 0.0  }
  0x2b   :  { %v121_v20 = vld [vmem:[%s1148_s1 + $0x318] sm:$0xff]  ;;  %v132_v23 = vld [vmem:[%s1148_s1 + $0x370] sm:$0xff]  ;;  %v648_v25 = vpack.c.bf16 %v117_v19, %v110_v18  ;;  %v127_v29 = vld [vmem:[%s1148_s1 + $0x348] sm:$0xff] }
  0x2c   :  { %v125_v22 = vld [vmem:[%s1148_s1 + $0x338] sm:$0xff]  ;;  %v586_v26 = vpack.c.bf16 %v128_v21, %v121_v20  ;;  %v120_v28 = vld [vmem:[%s1148_s1 + $0x310] sm:$0xff]  ;;  %v131_v31 = vld [vmem:[%s1148_s1 + $0x368] sm:$0xff] }
  0x2d   :  { %v650_v27 = vpack.c.bf16 %v132_v23, %v125_v22  ;;  %v124_v30 = vld [vmem:[%s1148_s1 + $0x330] sm:$0xff]  ;;  %v25_v32 = vld [vmem:[%s1148_s1 + $0x18] sm:$0xff]  ;;  %v588_v34 = vpack.c.bf16 %v127_v29, %v120_v28  ;;  %v31_v38 = vld [vmem:[%s1148_s1 + $0x48] sm:$0xff] }
  0x2e   :  { %581 = vmatpush1.bf16.xpose.msra.mxu1 %v580_v12  ;;  %v32_v33 = vld [vmem:[%s1148_s1 + $0x50] sm:$0xff]  ;;  %v652_v35 = vpack.c.bf16 %v131_v31, %v124_v30  ;;  %v35_v41 = vld [vmem:[%s1148_s1 + $0x68] sm:$0xff]  ;;  %v46_v43 = vld [vmem:[%s1148_s1 + $0xc0] sm:$0xff] }
  0x2f   :  { %645 = vmatpush1.bf16.xpose.msra.mxu0 %v644_v13  ;;  %583 = vmatprep.subr.bf16.mxu1 %v582_v14  ;;  %v590_v36 = vpack.c.bf16 %v32_v33, %v25_v32  ;;  %v24_v37 = vld [vmem:[%s1148_s1 + $0x10] sm:$0xff]  ;;  %v39_v42 = vld [vmem:[%s1148_s1 + $0x88] sm:$0xff]  ;;  %v15_v44 = vld [vmem:[%s1147_s0] sm:$0xff] }
  0x30   :  { %647 = vmatprep.subr.bf16.mxu0 %v646_v15  ;;  %v28_v39 = vld [vmem:[%s1148_s1 + $0x30] sm:$0xff]  ;;  %v592_v45 = vpack.c.bf16 %v31_v38, %v24_v37  ;;  %v19_v46 = vld [vmem:[%s1147_s0 + $0x20] sm:$0xff]  ;;  %v594_v48 = vpack.c.bf16 %v46_v43, %v39_v42  ;;  %vm975_vm1 = vmpackc.low %vm141_vm0, %vm141_vm0 }
  0x31   :  { %v655_v47 = vpack.c.bf16 %v35_v41, %v28_v39  ;;  %v18_v50 = vld [vmem:[%s1147_s0 + $0x18] sm:$0xff]  ;;  %v38_v51 = vld [vmem:[%s1148_s1 + $0x80] sm:$0xff]  ;;  %v60_v56 = vld [vmem:[%s1148_s1 + $0x130] sm:$0xff] }
  0x32   :  { %v45_v52 = vld [vmem:[%s1148_s1 + $0xb8] sm:$0xff]  ;;  %v42_v53 = vld [vmem:[%s1148_s1 + $0xa0] sm:$0xff]  ;;  %v52_v61 = vld [vmem:[%s1148_s1 + $0xf0] sm:$0xff] }
  0x33   :  { %v49_v54 = vld [vmem:[%s1148_s1 + $0xd8] sm:$0xff]  ;;  %v596_v58 = vpack.c.bf16 %v45_v52, %v38_v51  ;;  %v59_v62 = vld [vmem:[%s1148_s1 + $0x128] sm:$0xff]  ;;  %v56_v63 = vld [vmem:[%s1148_s1 + $0x110] sm:$0xff] }
  0x34   :  { %v53_v55 = vld [vmem:[%s1148_s1 + $0xf8] sm:$0xff]  ;;  %v659_v59 = vpack.c.bf16 %v49_v54, %v42_v53  ;;  %v63_v0 = vld [vmem:[%s1148_s1 + $0x148] sm:$0xff]  ;;  %v74_v2 = vld [vmem:[%s1148_s1 + $0x1a0] sm:$0xff]  ;;  %v600_v3 = vpack.c.bf16 %v59_v62, %v52_v61 }
  0x35   :  { %v598_v60 = vpack.c.bf16 %v60_v56, %v53_v55  ;;  %v67_v1 = vld [vmem:[%s1148_s1 + $0x168] sm:$0xff]  ;;  %v663_v4 = vpack.c.bf16 %v63_v0, %v56_v63  ;;  %v66_v6 = vld [vmem:[%s1148_s1 + $0x160] sm:$0xff]  ;;  %v73_v7 = vld [vmem:[%s1148_s1 + $0x198] sm:$0xff] }
  0x36   :  { %585 = vmatpush1.bf16.xpose.msra.mxu1 %v584_v24  ;;  %v602_v5 = vpack.c.bf16 %v74_v2, %v67_v1  ;;  %v70_v8 = vld [vmem:[%s1148_s1 + $0x180] sm:$0xff]  ;;  %v77_v9 = vld [vmem:[%s1148_s1 + $0x1b8] sm:$0xff]  ;;  %v88_v11 = vld [vmem:[%s1148_s1 + $0x210] sm:$0xff]  ;;  %v604_v12 = vpack.c.bf16 %v73_v7, %v66_v6 }
  0x37   :  { %649 = vmatpush1.bf16.xpose.msra.mxu0 %v648_v25  ;;  %587 = vmatprep.subr.bf16.mxu1 %v586_v26  ;;  %v81_v10 = vld [vmem:[%s1148_s1 + $0x1d8] sm:$0xff]  ;;  %v667_v13 = vpack.c.bf16 %v77_v9, %v70_v8  ;;  %v80_v15 = vld [vmem:[%s1148_s1 + $0x1d0] sm:$0xff]  ;;  %v87_v16 = vld [vmem:[%s1148_s1 + $0x208] sm:$0xff] }
  0x38   :  { %651 = vmatprep.subr.bf16.mxu0 %v650_v27  ;;  %v606_v14 = vpack.c.bf16 %v88_v11, %v81_v10  ;;  %v84_v17 = vld [vmem:[%s1148_s1 + $0x1f0] sm:$0xff]  ;;  %v91_v18 = vld [vmem:[%s1148_s1 + $0x228] sm:$0xff]  ;;  %v102_v20 = vld [vmem:[%s1148_s1 + $0x280] sm:$0xff]  ;;  %v608_v21 = vpack.c.bf16 %v87_v16, %v80_v15 }
  0x39   :  { %v95_v19 = vld [vmem:[%s1148_s1 + $0x248] sm:$0xff]  ;;  %v671_v22 = vpack.c.bf16 %v91_v18, %v84_v17  ;;  %v94_v24 = vld [vmem:[%s1148_s1 + $0x240] sm:$0xff]  ;;  %v101_v25 = vld [vmem:[%s1148_s1 + $0x278] sm:$0xff] }
  0x3a   :  { %v610_v23 = vpack.c.bf16 %v102_v20, %v95_v19  ;;  %v98_v26 = vld [vmem:[%s1148_s1 + $0x260] sm:$0xff]  ;;  %v105_v27 = vld [vmem:[%s1148_s1 + $0x298] sm:$0xff]  ;;  %v116_v29 = vld [vmem:[%s1148_s1 + $0x2f0] sm:$0xff]  ;;  %v612_v30 = vpack.c.bf16 %v101_v25, %v94_v24 }
  0x3b   :  { %v109_v28 = vld [vmem:[%s1148_s1 + $0x2b8] sm:$0xff]  ;;  %v675_v31 = vpack.c.bf16 %v105_v27, %v98_v26  ;;  %v108_v33 = vld [vmem:[%s1148_s1 + $0x2b0] sm:$0xff]  ;;  %v123_v37 = vld [vmem:[%s1148_s1 + $0x328] sm:$0xff] }
  0x3c   :  { %v614_v32 = vpack.c.bf16 %v116_v29, %v109_v28  ;;  %v130_v38 = vld [vmem:[%s1148_s1 + $0x360] sm:$0xff] }
  0x3d   :  { %v618_v42 = vpack.c.bf16 %v130_v38, %v123_v37  ;;  %v122_v43 = vld [vmem:[%s1148_s1 + $0x320] sm:$0xff] }
  0x3e   :  { %589 = vmatpush1.bf16.xpose.msra.mxu1 %v588_v34  ;;  %v115_v34 = vld [vmem:[%s1148_s1 + $0x2e8] sm:$0xff]  ;;  %v488_v51 = vld [vmem:[%s1149_s2] ss:$0 sm:$0xff] }
  0x3f   :  { %653 = vmatpush1.bf16.xpose.msra.mxu0 %v652_v35  ;;  %591 = vmatprep.subr.bf16.mxu1 %v590_v36  ;;  %v112_v35 = vld [vmem:[%s1148_s1 + $0x2d0] sm:$0xff]  ;;  %v119_v36 = vld [vmem:[%s1148_s1 + $0x308] sm:$0xff]  ;;  %v616_v39 = vpack.c.bf16 %v115_v34, %v108_v33 }
  0x40   :  { %654 = vmatprep.subr.bf16.mxu0 %v720_v40  ;;  %v679_v41 = vpack.c.bf16 %v119_v36, %v112_v35 }
  0x45   :  { %258 = vmatmul.mubr.f32.vlgmr.msra.gmra.mrb[0].mxu1 %v15_v44  ;;  %v129_v44 = vld [vmem:[%s1148_s1 + $0x358] sm:$0xff] }
  0x46   :  { %593 = vmatpush1.bf16.xpose.msra.mxu1 %v592_v45  ;;  %398 = vmatmul.mubr.f32.vlgmr.msra.gmra.mrb[0].mxu0 %v19_v46  ;;  %v126_v45 = vld [vmem:[%s1148_s1 + $0x340] sm:$0xff]  ;;  %v133_v46 = vld [vmem:[%s1148_s1 + $0x378] sm:$0xff]  ;;  %s723_s1 = smov [#allocation2]  }
  0x47   :  { %657 = vmatpush3.bf16.xpose.msk.msra.mxu0 %vm975_vm1, %v655_v47  ;;  %595 = vmatprep.subr.bf16.mxu1 %v594_v48  ;;  %v620_v47 = vpack.c.bf16 %v129_v44, %v122_v43  ;;  %v683_v48 = vpack.c.bf16 %v133_v46, %v126_v45  ;;  %s480_s9 = sshll.u32 %s723_s1, 4  ;;  %s481_s9 = int_to_ptr.vmem [resolvable:$true] %s480_s9 }
  0x48   :  { %658 = vmatprep.subr.bf16.mxu0 %v720_v40  ;;  %327 = vmatprep.mubr.f32.mxu1 %v18_v50  ;;  %v17_v50 = vld [vmem:[%s1147_s0 + $0x10] sm:$0xff]  ;;  %s696_s10 = scalar_lea.vmem %s481_s9, 128  ;;  %p701_p1 = scmp.lt.s32.totalorder %s481_s9, %s481_s9 }
  0x49   :  { %555 = vmatprep.mubr.msk.f32.mxu0 %vm721_vm2, %v722_v57  ;;  %p697_p0 = scmp.ne.s32.totalorder %s481_s9, %s696_s10  ;;  %p702_p2 = scmp.lt.s32.totalorder %s696_s10, %s696_s10 }
  0x4b   :  { %p703_p3 = por %p702_p2, %p701_p1 }
  0x4d   :  { %p704_p4 = pnand %p703_p3, %p697_p0 }
  0x4e   :  { %597 = vmatpush1.bf16.xpose.msra.mxu1 %v596_v58 }
  0x4f   :  { %661 = vmatpush3.bf16.xpose.msk.msra.mxu0 %vm975_vm1, %v659_v59  ;;  %599 = vmatprep.subr.bf16.mxu1 %v598_v60 }
  0x50   :  { %662 = vmatprep.subr.bf16.mxu0 %v720_v40 }
  0x56   :  { %601 = vmatpush1.bf16.xpose.msra.mxu1 %v600_v3 }
  0x57   :  { %665 = vmatpush3.bf16.xpose.msk.msra.mxu0 %vm975_vm1, %v663_v4  ;;  %603 = vmatprep.subr.bf16.mxu1 %v602_v5 }
  0x58   :  { %666 = vmatprep.subr.bf16.mxu0 %v720_v40 }
  0x5e   :  { %605 = vmatpush1.bf16.xpose.msra.mxu1 %v604_v12 }
  0x5f   :  { %669 = vmatpush3.bf16.xpose.msk.msra.mxu0 %vm975_vm1, %v667_v13  ;;  %607 = vmatprep.subr.bf16.mxu1 %v606_v14 }
  0x60   :  { %670 = vmatprep.subr.bf16.mxu0 %v720_v40 }
  0x66   :  { %609 = vmatpush1.bf16.xpose.msra.mxu1 %v608_v21 }
  0x67   :  { %673 = vmatpush3.bf16.xpose.msk.msra.mxu0 %vm975_vm1, %v671_v22  ;;  %611 = vmatprep.subr.bf16.mxu1 %v610_v23 }
  0x68   :  { %674 = vmatprep.subr.bf16.mxu0 %v720_v40 }
  0x6e   :  { %613 = vmatpush1.bf16.xpose.msra.mxu1 %v612_v30 }
  0x6f   :  { %677 = vmatpush3.bf16.xpose.msk.msra.mxu0 %vm975_vm1, %v675_v31  ;;  %615 = vmatprep.subr.bf16.mxu1 %v614_v32 }
  0x70   :  { %678 = vmatprep.subr.bf16.mxu0 %v720_v40 }
  0x76   :  { %617 = vmatpush1.bf16.xpose.msra.mxu1 %v616_v39 }
  0x77   :  { %681 = vmatpush3.bf16.xpose.msk.msra.mxu0 %vm975_vm1, %v679_v41  ;;  %619 = vmatprep.subr.bf16.mxu1 %v618_v42 }
  0x78   :  { %682 = vmatprep.subr.bf16.mxu0 %v720_v40  ;;  %v21_v40 = vld [vmem:[%s1147_s0 + $0x30] sm:$0xff] }
  0x7e   :  { %621 = vmatpush1.bf16.xpose.msra.mxu1 %v620_v47 }
  0x7f   :  { %685 = vmatpush3.bf16.xpose.msk.msra.mxu0 %vm975_vm1, %v683_v48 }
  0x85   :  { %328 = vmatmul.mubr.f32.vlgmr.msra.gmra.mrb[0].mxu1 %v17_v50 }
  0x86   :  { %556 = vmatmul.mubr.msk.f32.vlgmr.msra.gmra.mrb[0].mxu0 %vm141_vm0, %v21_v40 }
 0x158   :  { %v329_v52 = vpop.f32.mrb[0].mxu1 }
 0x159   :  { %v686_v49 = vadd.f32 %v488_v51, %v329_v52  ;;  %v469_v53 = vpop.f32.mrb[0].mxu0  ;;  %v331_v54 = vpop.f32.mrb[1].mxu1 }
 0x15a   :  { %v557_v55 = vpop.f32.mrb[1].mxu0 }
 0x15b   :  { %v687_v56 = vadd.f32 %v686_v49, %v469_v53 }
 0x15d   :  { %473 = vst [vmem:[#allocation2] sm:$0xff] %v687_v56 }
 0x15e   :  { %707 = shalt.err (!%p704_p4)
}
 0x15f   :  { %s708_s2 = scalar_lea.hbm %s1150_s3, 128 }
 0x160   :  { %p709_p5 = scmp.ne.s32.totalorder %s1150_s3, %s708_s2  ;;  %p712_p6 = scmp.lt.u32.totalorder %s708_s2, %s1150_s3 }
 0x162   :  { %p714_p7 = pnand %p712_p6, %p709_p5 }
 0x164   :  { %717 = shalt.err (!%p714_p7)
}
 0x165   :  { %483 = dma.vmem_to_hbm [thread:$0]  %s481_s9, 128, %s1150_s3, [#allocation3]  }
 0x166   :  { %718 = dma.done.wait [#allocation3], 128  }
 0x167   :  { %719 = vsyncadd [#allocation3], 4294967168 }
 0x168   :  { %487 = vsyncpa [#allocation3], 1 }

</bundles_post_ra>
